<compile_context>
chip_gen: v6e
topology: v6e:2x2x1
jax: 0.10.0
libtpu: 0.0.40
codegen_flags: <defaults>
</compile_context>

<pallas_src>
import functools

import jax
import jax.numpy as jnp
from jax.experimental import pallas as pl
from jax.experimental.pallas import tpu as pltpu


def _distill_kl_kernel(s_ref, t_ref, o_ref, *, inv_t):
    # (TB, C) tiles; C on the lane axis, rows on sublanes.
    s = s_ref[...].astype(jnp.float32) * inv_t          # student logits / T
    t = t_ref[...].astype(jnp.float32) * inv_t          # teacher logits / T

    # Student log-softmax: log_q = (s - max_s) - log(sum(exp(s - max_s)))
    m_s = jnp.max(s, axis=1, keepdims=True)              # (TB, 1)
    z_s = s - m_s
    lse_s = jnp.log(jnp.sum(jnp.exp(z_s), axis=1, keepdims=True))  # (TB, 1)
    log_q = z_s - lse_s

    # Teacher softmax statistics (never materialize p_t or log p_t full-width).
    m_t = jnp.max(t, axis=1, keepdims=True)               # (TB, 1)
    z_t = t - m_t
    e_t = jnp.exp(z_t)                                    # un-normalized probs
    sum_t = jnp.sum(e_t, axis=1, keepdims=True)           # (TB, 1)

    # KL per row:
    #   sum_j (e_t/sum_t) * ((z_t - log sum_t) - log_q)
    # = (1/sum_t) * sum_j e_t * (z_t - log_q) - log(sum_t)
    # Divide / log only on the (TB, 1) columns -> negligible EUP work.
    inner = jnp.sum(e_t * (z_t - log_q), axis=1, keepdims=True)    # (TB, 1)
    kl_row = inner / sum_t - jnp.log(sum_t)                         # (TB, 1)

    o_ref[...] = kl_row.astype(o_ref.dtype)


def distillation_loss(out_s, out_t, T, *, block_rows=256):
    """KL distillation loss matching the PyTorch module's forward. Returns a scalar."""
    assert out_s.shape == out_t.shape and out_s.ndim == 2
    B, C = out_s.shape

    # Batch tile: multiple of 8 (sublane) unless it covers the whole batch.
    # block_rows=256 keeps 2 inputs x 2 pipeline buffers well under the v7x
    # 64 MiB VMEM budget for typical class counts; raise it on v5e/v6e if C is small.
    tb = B if B <= block_rows else block_rows
    grid = (pl.cdiv(B, tb),)

    kernel = functools.partial(_distill_kl_kernel, inv_t=float(1.0 / T))

    per_row = pl.pallas_call(
        kernel,
        out_shape=jax.ShapeDtypeStruct((B, 1), jnp.float32),
        grid=grid,
        in_specs=[
            pl.BlockSpec((tb, C), lambda i: (i, 0)),
            pl.BlockSpec((tb, C), lambda i: (i, 0)),
        ],
        # Per-row KL; last dim 1 -> masked stores, but the output is only 4 B/row
        # so this is negligible.
        out_specs=pl.BlockSpec((tb, 1), lambda i: (i, 0)),
        compiler_params=pltpu.CompilerParams(
            dimension_semantics=("parallel",)),
    )(out_s, out_t)

    # batchmean reduction + T^2 scaling (tiny scalar work, done in plain JAX).
    return jnp.sum(per_row[:, 0]) / B * (T * T)


def _reference(out_s, out_t, T):
    log_q = jax.nn.log_softmax(out_s / T, axis=1)
    p = jax.nn.softmax(out_t / T, axis=1)
    kl = jnp.sum(p * (jnp.log(p) - log_q))
    return kl / out_s.shape[0] * (T * T)


if __name__ == "__main__":
    key = jax.random.PRNGKey(0)
    ks, kt = jax.random.split(key)
    B, C = 8, 32          # batch=8, num_classes=32
    T = 4.0
    out_s = jax.random.normal(ks, (B, C), dtype=jnp.float32)
    out_t = jax.random.normal(kt, (B, C), dtype=jnp.float32)

    loss = distillation_loss(out_s, out_t, T)
    jax.block_until_ready(loss)

    ref = _reference(out_s, out_t, T)
    assert loss.shape == ()
    assert jnp.allclose(loss, ref, atol=1e-5, rtol=1e-5), (loss, ref)
    print("KERNEL_OK")
</pallas_src>

<mosaic_0001>
module attributes {stable_mosaic.version = 11 : i64} {
  func.func @_distill_kl_kernel(%arg0: i32, %arg1: memref<8x32xf32, #tpu.memory_space<vmem>>, %arg2: memref<8x32xf32, #tpu.memory_space<vmem>>, %arg3: memref<8x1xf32, #tpu.memory_space<vmem>>) attributes {dimension_semantics = [#tpu.dimension_semantics<parallel>], iteration_bounds = array<i64: 1>, scalar_prefetch = 0 : i64, scratch_operands = 0 : i64, tpu.core_type = #tpu.core_type<tc>, window_params = [{transform_indices = @transform_0, window_bounds = array<i64: 8, 32>}, {transform_indices = @transform_1, window_bounds = array<i64: 8, 32>}, {transform_indices = @transform_2, window_bounds = array<i64: 8, 1>}]} {
    %c0 = arith.constant 0 : index
    %c0_0 = arith.constant 0 : index
    %0 = vector.load %arg1[%c0, %c0_0] : memref<8x32xf32, #tpu.memory_space<vmem>>, vector<8x32xf32>
    %cst = arith.constant 2.500000e-01 : f32
    %1 = vector.broadcast %cst : f32 to vector<8x32xf32>
    %2 = arith.mulf %0, %1 : vector<8x32xf32>
    %c0_1 = arith.constant 0 : index
    %c0_2 = arith.constant 0 : index
    %3 = vector.load %arg2[%c0_1, %c0_2] : memref<8x32xf32, #tpu.memory_space<vmem>>, vector<8x32xf32>
    %cst_3 = arith.constant 2.500000e-01 : f32
    %4 = vector.broadcast %cst_3 : f32 to vector<8x32xf32>
    %5 = arith.mulf %3, %4 : vector<8x32xf32>
    %cst_4 = arith.constant dense<0xFF800000> : vector<8xf32>
    %6 = vector.multi_reduction <maximumf>, %2, %cst_4 [1] : vector<8x32xf32> to vector<8xf32>
    %7 = vector.shape_cast %6 : vector<8xf32> to vector<8x1xf32>
    %8 = vector.broadcast %7 : vector<8x1xf32> to vector<8x32xf32>
    %9 = arith.subf %2, %8 : vector<8x32xf32>
    %10 = math.exp %9 : vector<8x32xf32>
    %cst_5 = arith.constant dense<0.000000e+00> : vector<8xf32>
    %11 = vector.multi_reduction <add>, %10, %cst_5 [1] : vector<8x32xf32> to vector<8xf32>
    %12 = vector.shape_cast %11 : vector<8xf32> to vector<8x1xf32>
    %13 = math.log %12 : vector<8x1xf32>
    %14 = vector.broadcast %13 : vector<8x1xf32> to vector<8x32xf32>
    %15 = arith.subf %9, %14 : vector<8x32xf32>
    %cst_6 = arith.constant dense<0xFF800000> : vector<8xf32>
    %16 = vector.multi_reduction <maximumf>, %5, %cst_6 [1] : vector<8x32xf32> to vector<8xf32>
    %17 = vector.shape_cast %16 : vector<8xf32> to vector<8x1xf32>
    %18 = vector.broadcast %17 : vector<8x1xf32> to vector<8x32xf32>
    %19 = arith.subf %5, %18 : vector<8x32xf32>
    %20 = math.exp %19 : vector<8x32xf32>
    %cst_7 = arith.constant dense<0.000000e+00> : vector<8xf32>
    %21 = vector.multi_reduction <add>, %20, %cst_7 [1] : vector<8x32xf32> to vector<8xf32>
    %22 = vector.shape_cast %21 : vector<8xf32> to vector<8x1xf32>
    %23 = arith.subf %19, %15 : vector<8x32xf32>
    %24 = arith.mulf %20, %23 : vector<8x32xf32>
    %cst_8 = arith.constant dense<0.000000e+00> : vector<8xf32>
    %25 = vector.multi_reduction <add>, %24, %cst_8 [1] : vector<8x32xf32> to vector<8xf32>
    %26 = vector.shape_cast %25 : vector<8xf32> to vector<8x1xf32>
    %27 = arith.divf %26, %22 : vector<8x1xf32>
    %28 = math.log %22 : vector<8x1xf32>
    %29 = arith.subf %27, %28 : vector<8x1xf32>
    %c0_9 = arith.constant 0 : index
    %c0_10 = arith.constant 0 : index
    %30 = vector.load %arg3[%c0_9, %c0_10] : memref<8x1xf32, #tpu.memory_space<vmem>>, vector<8x1xf32>
    tpu.vector_store %arg3[%c0_9, %c0_10], %29 {strides = array<i32>} : memref<8x1xf32, #tpu.memory_space<vmem>>, vector<8x1xf32>,
    return
  }
  func.func @transform_0(%arg0: i32) -> (i32, i32) {
    %c0_i32 = arith.constant 0 : i32
    %c0_i32_0 = arith.constant 0 : i32
    return %arg0, %c0_i32 : i32, i32
  }
  func.func @transform_1(%arg0: i32) -> (i32, i32) {
    %c0_i32 = arith.constant 0 : i32
    %c0_i32_0 = arith.constant 0 : i32
    return %arg0, %c0_i32 : i32, i32
  }
  func.func @transform_2(%arg0: i32) -> (i32, i32) {
    %c0_i32 = arith.constant 0 : i32
    %c0_i32_0 = arith.constant 0 : i32
    return %arg0, %c0_i32 : i32, i32
  }
}

</mosaic_0001>

<bundles_post_ra>
// kernel: tpu_custom_call.1
= control target key start
LH: loop header
LB: loop body
LE: loop exit
PB: predicated region body
PF: predicated region fallthrough
CT: control target
= control target key end

     0   :  { %7 = vsyncpa [#allocation3], 0  ;;  %s166_s0 = inlined_call_operand.hbm [shape: f32[8,32], index: 0, kind: input, shape index: {}]   ;;  %s167_s1 = inlined_call_operand.hbm [shape: f32[8,32], index: 1, kind: input, shape index: {}]   ;;  %s168_s2 = inlined_call_operand.vmem [shape: f32[8,1], index: 2, kind: output, shape index: {}]  }
   0x1   :  { %8 = vsyncpa [#allocation5], 0  ;;  %s135_s9 = smov [#allocation2]   ;;  %s136_s11 = smov [#allocation4]  }
   0x2   :  { %s15_s10 = sshll.u32 %s135_s9, 4  ;;  %s25_s12 = sshll.u32 %s136_s11, 4  ;;  %s16_s10 = int_to_ptr.vmem [resolvable:$true] %s15_s10  ;;  %s26_s12 = int_to_ptr.vmem [resolvable:$true] %s25_s12 }
   0x3   :  { %s99_s13 = scalar_lea.vmem %s16_s10, 128  ;;  %p104_p1 = scmp.lt.s32.totalorder %s16_s10, %s16_s10 }
   0x4   :  { %p100_p0 = scmp.ne.s32.totalorder %s16_s10, %s99_s13  ;;  %p105_p2 = scmp.lt.s32.totalorder %s99_s13, %s99_s13 }
   0x6   :  { %p106_p3 = por %p105_p2, %p104_p1 }
   0x8   :  { %p107_p4 = pnand %p106_p3, %p100_p0 }
   0xa   :  { %110 = shalt.err (!%p107_p4)
}
   0xb   :  { %18 = dma.hbm_to_vmem [thread:$0]  %s166_s0, 128, %s16_s10, [#allocation3]  }
   0xc   :  { %s119_s16 = scalar_lea.vmem %s26_s12, 128  ;;  %p124_p6 = scmp.lt.s32.totalorder %s26_s12, %s26_s12 }
   0xd   :  { %p120_p5 = scmp.ne.s32.totalorder %s26_s12, %s119_s16  ;;  %p125_p7 = scmp.lt.s32.totalorder %s119_s16, %s119_s16 }
   0xf   :  { %p126_p8 = por %p125_p7, %p124_p6 }
  0x11   :  { %p127_p9 = pnand %p126_p8, %p120_p5 }
  0x13   :  { %130 = shalt.err (!%p127_p9)
}
  0x14   :  { %28 = dma.hbm_to_vmem [thread:$0]  %s167_s1, 128, %s26_s12, [#allocation5]  }
  0x15   :  { %131 = dma.done.wait [#allocation3], 128  }
  0x16   :  { %132 = vsyncadd [#allocation3], 4294967168 }
  0x17   :  { %133 = dma.done.wait [#allocation5], 128  }
  0x18   :  { %134 = vsyncadd [#allocation5], 4294967168  ;;  %v35_v0 = vld [vmem:[#allocation2] sm:$0xff]  ;;  %vm39_vm0 = vcmask 261120   ;;  %v37_v3 = vld [vmem:[#allocation4] sm:$0xff]  ;;  %vm71_vm1 = vcmask 7168  }
  0x19   :  { %v36_v1 = vmul.f32 0.25, %v35_v0  ;;  %v38_v4 = vmul.f32 0.25, %v37_v3 }
  0x1b   :  { %v40_v2 = vsel %vm39_vm0, %v36_v1, -inf  ;;  %v52_v5 = vsel %vm39_vm0, %v38_v4, -inf }
  0x1c   :  { %41 = vmax.xlane.f32.xlu0 %v40_v2 }
  0x20   :  { %53 = vmax.xlane.f32.xlu0 %v52_v5 }
  0xa5   :  { %v42_v6 = vpop.xlane.xlu0 %41 }
  0xa6   :  { %v43_v7 = vsub.f32 %v36_v1, %v42_v6 }
  0xa8   :  { %v44_v8 = vmul.f32 1.442695, %v43_v7 }
  0xa9   :  { %v54_v10 = vpop.xlane.xlu0 %53 }
  0xaa   :  { %81 = vpow2.f32 %v44_v8  ;;  %v55_v12 = vsub.f32 %v38_v4, %v54_v10 }
  0xac   :  { %v56_v13 = vmul.f32 1.442695, %v55_v12 }
  0xae   :  { %83 = vpow2.f32 %v56_v13 }
  0xb7   :  { %v82_v9 = vpop.eup %81 }
  0xb8   :  { %v46_v11 = vsel %vm39_vm0, %v82_v9, 0.0 }
  0xb9   :  { %47 = vadd.xlane.f32.xlu1 %v46_v11 }
  0xbb   :  { %v84_v14 = vpop.eup %83 }
  0xbc   :  { %v58_v15 = vsel %vm39_vm0, %v84_v14, 0.0 }
  0xbd   :  { %59 = vadd.xlane.f32.xlu1 %v58_v15 }
 0x142   :  { %v48_v16 = vpop.xlane.xlu1 %47 }
 0x143   :  { %85 = vlog2.f32 %v48_v16 }
 0x146   :  { %v60_v23 = vpop.xlane.xlu1 %59 }
 0x147   :  { %87 = vlog2.f32 %v60_v23 }
 0x148   :  { %89 = vrcp.f32 %v60_v23 }
 0x150   :  { %v86_v17 = vpop.eup %85 }
 0x151   :  { %v50_v18 = vmul.f32 0.6931472, %v86_v17 }
 0x153   :  { %v51_v19 = vsub.f32 %v43_v7, %v50_v18 }
 0x154   :  { %v88_v24 = vpop.eup %87 }
 0x155   :  { %v61_v20 = vsub.f32 %v55_v12, %v51_v19  ;;  %v90_v25 = vpop.eup %89  ;;  %v69_v26 = vmul.f32 0.6931472, %v88_v24 }
 0x157   :  { %v62_v21 = vmul.f32 %v84_v14, %v61_v20 }
 0x159   :  { %v63_v22 = vsel %vm39_vm0, %v62_v21, 0.0 }
 0x15a   :  { %64 = vadd.xlane.f32.xlu0 %v63_v22 }
 0x1e3   :  { %v65_v27 = vpop.xlane.xlu0 %64 }
 0x1e4   :  { %v67_v28 = vmul.f32 %v90_v25, %v65_v27 }
 0x1e6   :  { %v70_v29 = vsub.f32 %v67_v28, %v69_v26 }
 0x1e8   :  { %72 = vst.msk [vmem:[%s168_s2] sm:$0xff] %vm71_vm1, %v70_v29 }
 0x1e9   :  { %77 = vsyncpa [#allocation3], 1 }
 0x1ea   :  { %78 = vsyncpa [#allocation5], 1 }

</bundles_post_ra>
